<compile_context>
chip_gen: v7x
topology: tpu7x:2x2x1
jax: 0.10.0
libtpu: 0.0.40
codegen_flags: <defaults>
</compile_context>

<pallas_src>
import jax
import jax.numpy as jnp
from jax.experimental import pallas as pl
from jax.experimental.pallas import tpu as pltpu


def _round_up(n, m):
    return ((n + m - 1) // m) * m


def _leaky_relu(x, slope=0.2):
    return jnp.where(x >= 0, x, slope * x)


def encoder_kernel(x_ref, w1_ref, b1_ref, w2_ref, b2_ref, wh_ref, bh_ref, o_ref):
    # One (padded) batch tile per grid step.  All three fused matmuls +
    # activations run on VMEM-resident tiles; the head matmul writes a single
    # lane-dense [tile_b, 128*k] block.
    x = x_ref[...]

    h = jnp.dot(x, w1_ref[...], preferred_element_type=jnp.float32) + b1_ref[...]
    h = _leaky_relu(h)

    h = jnp.dot(h, w2_ref[...], preferred_element_type=jnp.float32) + b2_ref[...]
    h = _leaky_relu(h)

    y = jnp.dot(h, wh_ref[...], preferred_element_type=jnp.float32) + bh_ref[...]
    o_ref[...] = y.astype(o_ref.dtype)


def encoder_forward(x, params, *, tile_b=512):
    """x: [B, input_dim] float32.

    params: dict with pre-transposed ([in, out]) weights and [1, out] biases:
      w1/b1 (input->hidden), w2/b2 (hidden->hidden),
      wm/bm (hidden->latent, mean head), wv/bv (hidden->latent, log_var head).

    Returns (mean, log_var), each [B, latent_dim] float32.
    """
    w1, b1, w2, b2 = params["w1"], params["b1"], params["w2"], params["b2"]
    wm, bm, wv, bv = params["wm"], params["bm"], params["wv"], params["bv"]

    B, input_dim = x.shape
    hidden_dim = w1.shape[1]
    latent_dim = wm.shape[1]

    # ---- fuse the two heads into one lane-dense matmul -----------------------
    # concat along the output axis, then zero-pad the output columns to a
    # multiple of 128 lanes (padded columns compute exact zeros -> sliced off).
    w_heads = jnp.concatenate([wm, wv], axis=1)          # [hidden, 2*latent]
    b_heads = jnp.concatenate([bm, bv], axis=1)          # [1, 2*latent]
    out_dim = 2 * latent_dim
    out_pad = _round_up(max(out_dim, 128), 128)
    if out_pad != out_dim:
        w_heads = jnp.pad(w_heads, ((0, 0), (0, out_pad - out_dim)))
        b_heads = jnp.pad(b_heads, ((0, 0), (0, out_pad - out_dim)))

    # ---- batch tiling: big tiles, ragged tail padded in the wrapper ----------
    tile_b = max(8, min(tile_b, _round_up(B, 8)))
    B_pad = _round_up(B, tile_b)
    x_p = jnp.pad(x, ((0, B_pad - B), (0, 0))) if B_pad != B else x
    grid = (B_pad // tile_b,)

    full = lambda arr: pl.BlockSpec(arr.shape, lambda i: (0,) * arr.ndim)

    out = pl.pallas_call(
        encoder_kernel,
        out_shape=jax.ShapeDtypeStruct((B_pad, out_pad), jnp.float32),
        grid_spec=pltpu.PrefetchScalarGridSpec(
            num_scalar_prefetch=0,
            grid=grid,
            in_specs=[
                pl.BlockSpec((tile_b, input_dim), lambda i: (i, 0)),  # x tile
                full(w1), full(b1),
                full(w2), full(b2),
                full(w_heads), full(b_heads),
            ],
            out_specs=pl.BlockSpec((tile_b, out_pad), lambda i: (i, 0)),
        ),
        compiler_params=pltpu.CompilerParams(
            dimension_semantics=("parallel",),
        ),
    )(x_p, w1, b1, w2, b2, w_heads, b_heads)

    out = out[:B]
    mean = out[:, :latent_dim]
    log_var = out[:, latent_dim:2 * latent_dim]
    return mean, log_var


def init_encoder_params(key, input_dim, hidden_dim, latent_dim):
    """Deterministic synthetic params mimicking PyTorch Linear's
    uniform(-1/sqrt(fan_in), 1/sqrt(fan_in)) init.  Weights are stored
    pre-transposed as [in, out]; biases as [1, out]."""
    ks = jax.random.split(key, 8)

    def lin(kw, kb, fan_in, fan_out):
        bound = 1.0 / jnp.sqrt(jnp.float32(fan_in))
        w = jax.random.uniform(kw, (fan_in, fan_out), jnp.float32, -bound, bound)
        b = jax.random.uniform(kb, (1, fan_out), jnp.float32, -bound, bound)
        return w, b

    w1, b1 = lin(ks[0], ks[1], input_dim, hidden_dim)
    w2, b2 = lin(ks[2], ks[3], hidden_dim, hidden_dim)
    wm, bm = lin(ks[4], ks[5], hidden_dim, latent_dim)
    wv, bv = lin(ks[6], ks[7], hidden_dim, latent_dim)
    return {"w1": w1, "b1": b1, "w2": w2, "b2": b2,
            "wm": wm, "bm": bm, "wv": wv, "bv": bv}


def encoder_reference(x, params):
    h = x @ params["w1"] + params["b1"]
    h = jnp.where(h >= 0, h, 0.2 * h)
    h = h @ params["w2"] + params["b2"]
    h = jnp.where(h >= 0, h, 0.2 * h)
    mean = h @ params["wm"] + params["bm"]
    log_var = h @ params["wv"] + params["bv"]
    return mean, log_var


if __name__ == "__main__":
    input_dim, hidden_dim, latent_dim = 16, 32, 8
    batch = 13  # deliberately NOT a multiple of 8 to exercise the padded tail

    key = jax.random.PRNGKey(0)
    k_x, k_p = jax.random.split(key)
    x = jax.random.normal(k_x, (batch, input_dim), jnp.float32)
    params = init_encoder_params(k_p, input_dim, hidden_dim, latent_dim)

    mean, log_var = encoder_forward(x, params, tile_b=512)
    mean = jax.block_until_ready(mean)
    log_var = jax.block_until_ready(log_var)

    mean_ref, log_var_ref = encoder_reference(x, params)
    assert mean.shape == (batch, latent_dim)
    assert log_var.shape == (batch, latent_dim)
    assert jnp.allclose(mean, mean_ref, atol=1e-5, rtol=1e-5), "mean mismatch"
    assert jnp.allclose(log_var, log_var_ref, atol=1e-5, rtol=1e-5), "log_var mismatch"

    print("KERNEL_OK")
</pallas_src>

<mosaic_0001>
module attributes {stable_mosaic.version = 11 : i64} {
  func.func @encoder_kernel(%arg0: i32, %arg1: memref<16x16xf32, #tpu.memory_space<vmem>>, %arg2: memref<16x32xf32, #tpu.memory_space<vmem>>, %arg3: memref<1x32xf32, #tpu.memory_space<vmem>>, %arg4: memref<32x32xf32, #tpu.memory_space<vmem>>, %arg5: memref<1x32xf32, #tpu.memory_space<vmem>>, %arg6: memref<32x128xf32, #tpu.memory_space<vmem>>, %arg7: memref<1x128xf32, #tpu.memory_space<vmem>>, %arg8: memref<16x128xf32, #tpu.memory_space<vmem>>) attributes {dimension_semantics = [#tpu.dimension_semantics<parallel>], iteration_bounds = array<i64: 1>, scalar_prefetch = 0 : i64, scratch_operands = 0 : i64, tpu.core_type = #tpu.core_type<tc>, window_params = [{transform_indices = @transform_0, window_bounds = array<i64: 16, 16>}, {pipeline_mode = #tpu.pipeline_mode<synchronous>, transform_indices = @transform_1, window_bounds = array<i64: 16, 32>}, {pipeline_mode = #tpu.pipeline_mode<synchronous>, transform_indices = @transform_2, window_bounds = array<i64: 1, 32>}, {pipeline_mode = #tpu.pipeline_mode<synchronous>, transform_indices = @transform_3, window_bounds = array<i64: 32, 32>}, {pipeline_mode = #tpu.pipeline_mode<synchronous>, transform_indices = @transform_4, window_bounds = array<i64: 1, 32>}, {pipeline_mode = #tpu.pipeline_mode<synchronous>, transform_indices = @transform_5, window_bounds = array<i64: 32, 128>}, {pipeline_mode = #tpu.pipeline_mode<synchronous>, transform_indices = @transform_6, window_bounds = array<i64: 1, 128>}, {transform_indices = @transform_7, window_bounds = array<i64: 16, 128>}]} {
    %c0 = arith.constant 0 : index
    %c0_0 = arith.constant 0 : index
    %0 = vector.load %arg1[%c0, %c0_0] : memref<16x16xf32, #tpu.memory_space<vmem>>, vector<16x16xf32>
    %c0_1 = arith.constant 0 : index
    %c0_2 = arith.constant 0 : index
    %1 = vector.load %arg2[%c0_1, %c0_2] : memref<16x32xf32, #tpu.memory_space<vmem>>, vector<16x32xf32>
    %cst = arith.constant dense<0.000000e+00> : vector<16x32xf32>
    %2 = tpu.matmul %0, %1, %cst {dimension_numbers = #tpu.dot_dimension_numbers<[1], [0], [0], [1], [0, 0, 1, 1], [], []>} : vector<16x16xf32>, vector<16x32xf32>, vector<16x32xf32> -> vector<16x32xf32>
    %c0_3 = arith.constant 0 : index
    %c0_4 = arith.constant 0 : index
    %3 = vector.load %arg3[%c0_3, %c0_4] : memref<1x32xf32, #tpu.memory_space<vmem>>, vector<1x32xf32>
    %4 = vector.broadcast %3 : vector<1x32xf32> to vector<16x32xf32>
    %5 = arith.addf %2, %4 : vector<16x32xf32>
    %cst_5 = arith.constant 0.000000e+00 : f32
    %6 = vector.broadcast %cst_5 : f32 to vector<16x32xf32>
    %7 = arith.cmpf oge, %5, %6 : vector<16x32xf32>
    %cst_6 = arith.constant 2.000000e-01 : f32
    %8 = vector.broadcast %cst_6 : f32 to vector<16x32xf32>
    %9 = arith.mulf %8, %5 : vector<16x32xf32>
    %10 = arith.select %7, %5, %9 : vector<16x32xi1>, vector<16x32xf32>
    %c0_7 = arith.constant 0 : index
    %c0_8 = arith.constant 0 : index
    %11 = vector.load %arg4[%c0_7, %c0_8] : memref<32x32xf32, #tpu.memory_space<vmem>>, vector<32x32xf32>
    %cst_9 = arith.constant dense<0.000000e+00> : vector<16x32xf32>
    %12 = tpu.matmul %10, %11, %cst_9 {dimension_numbers = #tpu.dot_dimension_numbers<[1], [0], [0], [1], [0, 0, 1, 1], [], []>} : vector<16x32xf32>, vector<32x32xf32>, vector<16x32xf32> -> vector<16x32xf32>
    %c0_10 = arith.constant 0 : index
    %c0_11 = arith.constant 0 : index
    %13 = vector.load %arg5[%c0_10, %c0_11] : memref<1x32xf32, #tpu.memory_space<vmem>>, vector<1x32xf32>
    %14 = vector.broadcast %13 : vector<1x32xf32> to vector<16x32xf32>
    %15 = arith.addf %12, %14 : vector<16x32xf32>
    %cst_12 = arith.constant 0.000000e+00 : f32
    %16 = vector.broadcast %cst_12 : f32 to vector<16x32xf32>
    %17 = arith.cmpf oge, %15, %16 : vector<16x32xf32>
    %cst_13 = arith.constant 2.000000e-01 : f32
    %18 = vector.broadcast %cst_13 : f32 to vector<16x32xf32>
    %19 = arith.mulf %18, %15 : vector<16x32xf32>
    %20 = arith.select %17, %15, %19 : vector<16x32xi1>, vector<16x32xf32>
    %c0_14 = arith.constant 0 : index
    %c0_15 = arith.constant 0 : index
    %21 = vector.load %arg6[%c0_14, %c0_15] : memref<32x128xf32, #tpu.memory_space<vmem>>, vector<32x128xf32>
    %cst_16 = arith.constant dense<0.000000e+00> : vector<16x128xf32>
    %22 = tpu.matmul %20, %21, %cst_16 {dimension_numbers = #tpu.dot_dimension_numbers<[1], [0], [0], [1], [0, 0, 1, 1], [], []>} : vector<16x32xf32>, vector<32x128xf32>, vector<16x128xf32> -> vector<16x128xf32>
    %c0_17 = arith.constant 0 : index
    %c0_18 = arith.constant 0 : index
    %23 = vector.load %arg7[%c0_17, %c0_18] : memref<1x128xf32, #tpu.memory_space<vmem>>, vector<1x128xf32>
    %24 = vector.broadcast %23 : vector<1x128xf32> to vector<16x128xf32>
    %25 = arith.addf %22, %24 : vector<16x128xf32>
    %c0_19 = arith.constant 0 : index
    %c0_20 = arith.constant 0 : index
    %26 = vector.load %arg8[%c0_19, %c0_20] : memref<16x128xf32, #tpu.memory_space<vmem>>, vector<16x128xf32>
    tpu.vector_store %arg8[%c0_19, %c0_20], %25 {strides = array<i32>} : memref<16x128xf32, #tpu.memory_space<vmem>>, vector<16x128xf32>,
    return
  }
  func.func @transform_0(%arg0: i32) -> (i32, i32) {
    %c0_i32 = arith.constant 0 : i32
    %c0_i32_0 = arith.constant 0 : i32
    return %arg0, %c0_i32 : i32, i32
  }
  func.func @transform_1(%arg0: i32) -> (i32, i32) {
    %c0_i32 = arith.constant 0 : i32
    %c0_i32_0 = arith.constant 0 : i32
    %c0_i32_1 = arith.constant 0 : i32
    return %c0_i32, %c0_i32_0 : i32, i32
  }
  func.func @transform_2(%arg0: i32) -> (i32, i32) {
    %c0_i32 = arith.constant 0 : i32
    %c0_i32_0 = arith.constant 0 : i32
    %c0_i32_1 = arith.constant 0 : i32
    return %c0_i32, %c0_i32_0 : i32, i32
  }
  func.func @transform_3(%arg0: i32) -> (i32, i32) {
    %c0_i32 = arith.constant 0 : i32
    %c0_i32_0 = arith.constant 0 : i32
    %c0_i32_1 = arith.constant 0 : i32
    return %c0_i32, %c0_i32_0 : i32, i32
  }
  func.func @transform_4(%arg0: i32) -> (i32, i32) {
    %c0_i32 = arith.constant 0 : i32
    %c0_i32_0 = arith.constant 0 : i32
    %c0_i32_1 = arith.constant 0 : i32
    return %c0_i32, %c0_i32_0 : i32, i32
  }
  func.func @transform_5(%arg0: i32) -> (i32, i32) {
    %c0_i32 = arith.constant 0 : i32
    %c0_i32_0 = arith.constant 0 : i32
    %c0_i32_1 = arith.constant 0 : i32
    return %c0_i32, %c0_i32_0 : i32, i32
  }
  func.func @transform_6(%arg0: i32) -> (i32, i32) {
    %c0_i32 = arith.constant 0 : i32
    %c0_i32_0 = arith.constant 0 : i32
    %c0_i32_1 = arith.constant 0 : i32
    return %c0_i32, %c0_i32_0 : i32, i32
  }
  func.func @transform_7(%arg0: i32) -> (i32, i32) {
    %c0_i32 = arith.constant 0 : i32
    %c0_i32_0 = arith.constant 0 : i32
    return %arg0, %c0_i32 : i32, i32
  }
}

</mosaic_0001>

<bundles_post_ra>
// kernel: tpu_custom_call.1
= control target key start
LH: loop header
LB: loop body
LE: loop exit
PB: predicated region body
PF: predicated region fallthrough
CT: control target
= control target key end

     0   :  { %12 = vsyncpa [#allocation3], 0  ;;  %s741_s0 = inlined_call_operand.hbm [shape: f32[16,16], index: 0, kind: input, shape index: {}]   ;;  %s742_s1 = inlined_call_operand.hbm [shape: f32[16,32], index: 1, kind: input, shape index: {}]   ;;  %s743_s2 = inlined_call_operand.vmem [shape: f32[1,32], index: 2, kind: input, shape index: {}]   ;;  %s744_s3 = inlined_call_operand.hbm [shape: f32[32,32], index: 3, kind: input, shape index: {}]   ;;  %s745_s4 = inlined_call_operand.vmem [shape: f32[1,32], index: 4, kind: input, shape index: {}]   ;;  %s746_s5 = inlined_call_operand.hbm [shape: f32[32,128], index: 5, kind: input, shape index: {}]   ;;  %s747_s6 = inlined_call_operand.vmem [shape: f32[1,128], index: 6, kind: input, shape index: {}]   ;;  %s748_s7 = inlined_call_operand.hbm [shape: f32[16,128], index: 7, kind: output, shape index: {}]  }
   0x1   :  { %13 = vsyncpa [#allocation6], 0 }
   0x2   :  { %14 = vsyncpa [#allocation9], 0 }
   0x3   :  { %15 = vsyncpa [#allocation4], 0  ;;  %s592_s24 = smov [#allocation5]   ;;  %s593_s26 = smov [#allocation2]  }
   0x4   :  { %s33_s25 = sshll.u32 %s592_s24, 4  ;;  %s21_s27 = sshll.u32 %s593_s26, 4  ;;  %s34_s25 = int_to_ptr.vmem [resolvable:$true] %s33_s25  ;;  %s639_s27 = int_to_ptr.vmem [resolvable:$true] %s21_s27 }
   0x5   :  { %s474_s30 = scalar_lea.hbm %s742_s1, 256 }
   0x6   :  { %p475_p0 = scmp.ne.s32.totalorder %s742_s1, %s474_s30  ;;  %p478_p1 = scmp.lt.u32.totalorder %s474_s30, %s742_s1 }
   0x8   :  { %p480_p2 = pnand %p478_p1, %p475_p0 }
   0xa   :  { %483 = shalt.err (!%p480_p2)
}
   0xb   :  { %s484_s12 = scalar_lea.vmem %s34_s25, 256  ;;  %p489_p4 = scmp.lt.s32.totalorder %s34_s25, %s34_s25 }
   0xc   :  { %p485_p3 = scmp.ne.s32.totalorder %s34_s25, %s484_s12  ;;  %p490_p5 = scmp.lt.s32.totalorder %s484_s12, %s484_s12 }
   0xe   :  { %p491_p6 = por %p490_p5, %p489_p4 }
  0x10   :  { %p492_p7 = pnand %p491_p6, %p485_p3 }
  0x12   :  { %495 = shalt.err (!%p492_p7)
}
  0x13   :  { %s594_s13 = smov 128   ;;  %s595_s14 = smov 8  }
  0x14   :  { %39 = dma.hbm_to_vmem [thread:$0]  %s742_s1, 256, %s34_s25, [#allocation6], %s594_s13, %s594_s13, %s595_s14  }
  0x15   :  { %s496_s19 = scalar_lea.hbm %s741_s0, 256 }
  0x16   :  { %p497_p8 = scmp.ne.s32.totalorder %s741_s0, %s496_s19  ;;  %p500_p9 = scmp.lt.u32.totalorder %s496_s19, %s741_s0 }
  0x18   :  { %p502_p10 = pnand %p500_p9, %p497_p8 }
  0x1a   :  { %505 = shalt.err (!%p502_p10)
}
  0x1b   :  { %s506_s24 = scalar_lea.vmem %s639_s27, 256  ;;  %p511_p12 = scmp.lt.s32.totalorder %s639_s27, %s639_s27 }
  0x1c   :  { %p507_p11 = scmp.ne.s32.totalorder %s639_s27, %s506_s24  ;;  %p512_p13 = scmp.lt.s32.totalorder %s506_s24, %s506_s24 }
  0x1e   :  { %p513_p0 = por %p512_p13, %p511_p12 }
  0x20   :  { %p514_p1 = pnand %p513_p0, %p507_p11 }
  0x22   :  { %517 = shalt.err (!%p514_p1)
}
  0x23   :  { %27 = dma.hbm_to_vmem [thread:$0]  %s741_s0, 256, %s639_s27, [#allocation3], %s594_s13, %s594_s13, %s595_s14  }
  0x24   :  { %s596_s26 = smov [#allocation7]   ;;  %s597_s29 = smov [#allocation8]  }
  0x25   :  { %s47_s28 = sshll.u32 %s596_s26, 4  ;;  %s61_s30 = sshll.u32 %s597_s29, 4  ;;  %s48_s28 = int_to_ptr.vmem [resolvable:$true] %s47_s28  ;;  %s676_s30 = int_to_ptr.vmem [resolvable:$true] %s61_s30 }
  0x26   :  { %s518_s10 = scalar_lea.hbm %s744_s3, 512 }
  0x27   :  { %p519_p2 = scmp.ne.s32.totalorder %s744_s3, %s518_s10  ;;  %p522_p3 = scmp.lt.u32.totalorder %s518_s10, %s744_s3 }
  0x29   :  { %p524_p4 = pnand %p522_p3, %p519_p2 }
  0x2b   :  { %527 = shalt.err (!%p524_p4)
}
  0x2c   :  { %s528_s0 = scalar_lea.vmem %s48_s28, 512  ;;  %p533_p6 = scmp.lt.s32.totalorder %s48_s28, %s48_s28 }
  0x2d   :  { %p529_p5 = scmp.ne.s32.totalorder %s48_s28, %s528_s0  ;;  %p534_p7 = scmp.lt.s32.totalorder %s528_s0, %s528_s0 }
  0x2f   :  { %p535_p8 = por %p534_p7, %p533_p6 }
  0x31   :  { %p536_p9 = pnand %p535_p8, %p529_p5 }
  0x33   :  { %539 = shalt.err (!%p536_p9)
}
  0x34   :  { %53 = dma.hbm_to_vmem [thread:$0]  %s744_s3, 512, %s48_s28, [#allocation6], %s594_s13, %s594_s13, %s595_s14  }
  0x35   :  { %s540_s20 = scalar_lea.hbm %s746_s5, 512 }
  0x36   :  { %p541_p10 = scmp.ne.s32.totalorder %s746_s5, %s540_s20  ;;  %p544_p11 = scmp.lt.u32.totalorder %s540_s20, %s746_s5 }
  0x38   :  { %p546_p12 = pnand %p544_p11, %p541_p10 }
  0x3a   :  { %549 = shalt.err (!%p546_p12)
}
  0x3b   :  { %s550_s1 = scalar_lea.vmem %s676_s30, 512  ;;  %p555_p0 = scmp.lt.s32.totalorder %s676_s30, %s676_s30 }
  0x3c   :  { %p551_p13 = scmp.ne.s32.totalorder %s676_s30, %s550_s1  ;;  %p556_p1 = scmp.lt.s32.totalorder %s550_s1, %s550_s1 }
  0x3e   :  { %p557_p2 = por %p556_p1, %p555_p0 }
  0x40   :  { %p558_p3 = pnand %p557_p2, %p551_p13 }
  0x42   :  { %561 = shalt.err (!%p558_p3)
}
  0x43   :  { %67 = dma.hbm_to_vmem [thread:$0]  %s746_s5, 512, %s676_s30, [#allocation9], %s594_s13, %s594_s13, %s595_s14  }
  0x44   :  { %584 = dma.done.wait [#allocation3], 256  }
  0x45   :  { %585 = vsyncadd [#allocation3], 4294967040 }
  0x46   :  { %586 = dma.done.wait [#allocation6], 768  }
  0x47   :  { %587 = vsyncadd [#allocation6], 4294966528 }
  0x48   :  { %588 = dma.done.wait [#allocation9], 512  }
  0x49   :  { %589 = vsyncadd [#allocation9], 4294966784  ;;  %vm93_vm0 = vcmask 130048   ;;  %v84_v0 = vld [vmem:[#allocation5] sm:$0xff]  ;;  %v85_v1 = vld [vmem:[#allocation5 + $0x8] sm:$0xff]  ;;  %vm192_vm3 = vcmask 261120  }
  0x4a   :  { %v82_v2 = vld [vmem:[#allocation2] sm:$0xff]  ;;  %v447_v3 = vpack.c.bf16 %v85_v1, %v84_v0  ;;  %v83_v4 = vld [vmem:[#allocation2 + $0x8] sm:$0xff]  ;;  %v183_v8 = vld [vmem:[#allocation7 + $0x10] sm:$0xff]  ;;  %s598_s8 = smov [#allocation10]  }
  0x4b   :  { %422 = vmatprep.mubr.msk.f32.mxu0 %vm93_vm0, %v82_v2  ;;  %v181_v5 = vld [vmem:[#allocation7] sm:$0xff]  ;;  %v182_v6 = vld [vmem:[#allocation7 + $0x8] sm:$0xff]  ;;  %v184_v9 = vld [vmem:[#allocation7 + $0x18] sm:$0xff] }
  0x4c   :  { %448 = vmatprep.subr.bf16.mxu0 %v447_v3  ;;  %v451_v7 = vpack.c.bf16 %v182_v6, %v181_v5  ;;  %v455_v10 = vpack.c.bf16 %v184_v9, %v183_v8  ;;  %v393_v11 = vld [vmem:[%s743_s2] ss:$0 sm:$0xff]  ;;  %v281_v21 = vld [vmem:[#allocation8 + $0x8] sm:$0xff]  ;;  %v282_v23 = vld [vmem:[#allocation8 + $0x10] sm:$0xff] }
  0x4d   :  { %450 = vmatpush3.bf16.msra.mxu0 %v447_v3  ;;  %v280_v20 = vld [vmem:[#allocation8] sm:$0xff]  ;;  %v283_v24 = vld [vmem:[#allocation8 + $0x18] sm:$0xff] }
  0x4e   :  { %452 = vmatprep.subr.bf16.mxu1 %v451_v7  ;;  %v459_v22 = vpack.c.bf16 %v281_v21, %v280_v20  ;;  %v463_v25 = vpack.c.bf16 %v283_v24, %v282_v23  ;;  %v396_v26 = vld [vmem:[%s745_s4] ss:$0 sm:$0xff]  ;;  %s379_s4 = sshll.u32 %s598_s8, 4  ;;  %s380_s4 = int_to_ptr.vmem [resolvable:$true] %s379_s4 }
  0x4f   :  { %454 = vmatpush3.bf16.msra.mxu1 %v451_v7  ;;  %v399_v35 = vld [vmem:[%s747_s6] ss:$0 sm:$0xff]  ;;  %s562_s9 = scalar_lea.vmem %s380_s4, 256  ;;  %p567_p5 = scmp.lt.s32.totalorder %s380_s4, %s380_s4 }
  0x50   :  { %423 = vmatmul.mubr.msk.f32.vlgmr.msra.gmra.mrb[0].mxu0 %vm93_vm0, %v83_v4  ;;  %456 = vmatprep.subr.bf16.mxu1 %v455_v10  ;;  %p563_p4 = scmp.ne.s32.totalorder %s380_s4, %s562_s9  ;;  %p568_p6 = scmp.lt.s32.totalorder %s562_s9, %s562_s9 }
  0x51   :  { %460 = vmatprep.subr.bf16.mxu0 %v459_v22 }
  0x52   :  { %462 = vmatpush3.bf16.msra.mxu0 %v459_v22  ;;  %p569_p7 = por %p568_p6, %p567_p5 }
  0x53   :  { %458 = vmatpush3.bf16.msra.mxu1 %v455_v10  ;;  %464 = vmatprep.subr.bf16.mxu0 %v463_v25 }
  0x54   :  { %p570_p8 = pnand %p569_p7, %p563_p4 }
  0x56   :  { %466 = vmatpush3.bf16.msra.mxu0 %v463_v25 }
 0x123   :  { %v424_v12 = vpop.f32.mrb[0].mxu0 }
 0x124   :  { %v172_v13 = vadd.f32 %v424_v12, %v393_v11  ;;  %v166_v14 = vpop.f32.mrb[1].mxu0 }
 0x125   :  { %v167_v15 = vadd.f32 %v393_v11, %v166_v14 }
 0x126   :  { %v178_v16 = vmul.f32 0.2, %v172_v13  ;;  %vm176_vm1 = vcmp.ge.f32.partialorder %v172_v13, 0.0 }
 0x127   :  { %vm175_vm2 = vcmp.ge.f32.partialorder %v167_v15, 0.0  ;;  %v177_v17 = vmul.f32 0.2, %v167_v15 }
 0x128   :  { %v180_v19 = vsel %vm176_vm1, %v172_v13, %v178_v16 }
 0x129   :  { %v179_v18 = vsel %vm175_vm2, %v167_v15, %v177_v17 }
 0x12a   :  { %433 = vmatprep.mubr.msk.f32.mxu1 %vm192_vm3, %v179_v18 }
 0x12b   :  { %434 = vmatmul.mubr.msk.f32.vlgmr.msra.gmra.mrb[0].mxu1 %vm192_vm3, %v180_v19 }
 0x1fe   :  { %v435_v27 = vpop.f32.mrb[0].mxu1 }
 0x1ff   :  { %v271_v28 = vadd.f32 %v435_v27, %v396_v26  ;;  %v265_v29 = vpop.f32.mrb[1].mxu1 }
 0x200   :  { %v266_v30 = vadd.f32 %v396_v26, %v265_v29 }
 0x201   :  { %v277_v31 = vmul.f32 0.2, %v271_v28  ;;  %vm275_vm4 = vcmp.ge.f32.partialorder %v271_v28, 0.0 }
 0x202   :  { %vm274_vm5 = vcmp.ge.f32.partialorder %v266_v30, 0.0  ;;  %v276_v32 = vmul.f32 0.2, %v266_v30 }
 0x203   :  { %v279_v34 = vsel %vm275_vm4, %v271_v28, %v277_v31 }
 0x204   :  { %v278_v33 = vsel %vm274_vm5, %v266_v30, %v276_v32 }
 0x205   :  { %444 = vmatprep.mubr.msk.f32.mxu0 %vm192_vm3, %v278_v33 }
 0x206   :  { %445 = vmatmul.mubr.msk.f32.vlgmr.msra.gmra.mrb[2].mxu0 %vm192_vm3, %v279_v34 }
 0x2d9   :  { %v446_v36 = vpop.f32.mrb[2].mxu0 }
 0x2da   :  { %v369_v37 = vadd.f32 %v446_v36, %v399_v35  ;;  %v363_v38 = vpop.f32.mrb[3].mxu0 }
 0x2db   :  { %v364_v39 = vadd.f32 %v399_v35, %v363_v38 }
 0x2dc   :  { %373 = vst [vmem:[#allocation10 + $0x8] sm:$0xff] %v369_v37 }
 0x2dd   :  { %372 = vst [vmem:[#allocation10] sm:$0xff] %v364_v39 }
 0x2de   :  { %573 = shalt.err (!%p570_p8)
}
 0x2df   :  { %s574_s6 = scalar_lea.hbm %s748_s7, 256 }
 0x2e0   :  { %p575_p9 = scmp.ne.s32.totalorder %s748_s7, %s574_s6  ;;  %p578_p10 = scmp.lt.u32.totalorder %s574_s6, %s748_s7 }
 0x2e2   :  { %p580_p11 = pnand %p578_p10, %p575_p9 }
 0x2e4   :  { %583 = shalt.err (!%p580_p11)
}
 0x2e5   :  { %385 = dma.vmem_to_hbm [thread:$0]  %s380_s4, 256, %s748_s7, [#allocation4], %s594_s13, %s594_s13, %s595_s14  }
 0x2e6   :  { %590 = dma.done.wait [#allocation4], 256  }
 0x2e7   :  { %591 = vsyncadd [#allocation4], 4294967040 }
 0x2e8   :  { %389 = vsyncpa [#allocation3], 1 }
 0x2e9   :  { %390 = vsyncpa [#allocation6], 1 }
 0x2ea   :  { %391 = vsyncpa [#allocation9], 1 }
 0x2eb   :  { %392 = vsyncpa [#allocation4], 1 }

</bundles_post_ra>
